<compile_context>
chip_gen: v7x
topology: tpu7x:2x2x1
jax: 0.10.0
libtpu: 0.0.40
codegen_flags: <defaults>
</compile_context>

<pallas_src>
import jax
import jax.numpy as jnp
from jax.experimental import pallas as pl
from jax.experimental.pallas import tpu as pltpu

LANES = 128            # lane-dense last dim (full vreg width -> unmasked stores)
MAX_BLOCK_ROWS = 4096  # 4096 x 128 x 4B = 2 MiB per block (double-buffered: 8 MiB)


def reflect_exp_kernel(x_ref, o_ref):
    x = x_ref[...]
    # exp(-|x|) never overflows and is the exp term needed by BOTH branches.
    e = jnp.exp(-jnp.abs(x))
    pos = x * x + 1.0 - e          # branch for x > 0  : -exp(-x) + x^2 + 1
    neg = e - 1.0                  # branch for x <= 0 :  exp(x) - 1
    o_ref[...] = jnp.where(x > 0.0, pos, neg).astype(o_ref.dtype)


def reflect_exp(x):
    """ReflectExp forward for an arbitrary-shaped float array."""
    orig_shape = x.shape
    orig_dtype = x.dtype
    flat = x.reshape(-1)
    n = flat.shape[0]

    # Lay the data out lane-dense: (rows, 128).
    rows = pl.cdiv(n, LANES)
    if rows <= MAX_BLOCK_ROWS:
        block_rows = rows                      # single grid step, full-array block
    else:
        block_rows = MAX_BLOCK_ROWS            # tiled; pad rows to a block multiple
        rows = pl.cdiv(rows, block_rows) * block_rows

    padded = rows * LANES
    if padded != n:
        flat = jnp.pad(flat, (0, padded - n))  # zero pad: exp(0)-1 = 0, harmless
    x2d = flat.reshape(rows, LANES)

    num_blocks = rows // block_rows

    out2d = pl.pallas_call(
        reflect_exp_kernel,
        out_shape=jax.ShapeDtypeStruct((rows, LANES), orig_dtype),
        grid=(num_blocks,),
        in_specs=[pl.BlockSpec((block_rows, LANES), lambda i: (i, 0))],
        out_specs=pl.BlockSpec((block_rows, LANES), lambda i: (i, 0)),
        compiler_params=pltpu.CompilerParams(
            dimension_semantics=("parallel",),   # independent blocks -> megacore OK
        ),
    )(x2d)

    return out2d.reshape(-1)[:n].reshape(orig_shape)


def reflect_exp_reference(x):
    # Literal transcription of the PyTorch forward.
    return jnp.where(x > 0.0, -jnp.exp(-x) + x ** 2 + 1.0, jnp.exp(x) - 1.0)


if __name__ == "__main__":
    key = jax.random.PRNGKey(0)
    k0, k1 = jax.random.split(key)

    # Primary small example, shape consistent with a generic activation module.
    x = jax.random.normal(k0, (2, 4, 16, 16), dtype=jnp.float32) * 3.0
    out = jax.block_until_ready(reflect_exp(x))
    ref = reflect_exp_reference(x)
    assert out.shape == x.shape
    assert jnp.allclose(out, ref, atol=1e-5, rtol=1e-5), "mismatch vs reference (small)"

    # Secondary check: odd size -> exercises padding + multi-block tiled path.
    x2 = jax.random.normal(k1, (1030, 1024), dtype=jnp.float32) * 3.0
    out2 = jax.block_until_ready(reflect_exp(x2))
    ref2 = reflect_exp_reference(x2)
    assert out2.shape == x2.shape
    assert jnp.allclose(out2, ref2, atol=1e-5, rtol=1e-5), "mismatch vs reference (tiled)"

    print("KERNEL_OK")
</pallas_src>

<mosaic_0001>
module attributes {stable_mosaic.version = 11 : i64} {
  func.func @reflect_exp_kernel(%arg0: i32, %arg1: memref<16x128xf32, #tpu.memory_space<vmem>>, %arg2: memref<16x128xf32, #tpu.memory_space<vmem>>) attributes {dimension_semantics = [#tpu.dimension_semantics<parallel>], iteration_bounds = array<i64: 1>, scalar_prefetch = 0 : i64, scratch_operands = 0 : i64, tpu.core_type = #tpu.core_type<tc>, window_params = [{transform_indices = @transform_0, window_bounds = array<i64: 16, 128>}, {transform_indices = @transform_1, window_bounds = array<i64: 16, 128>}]} {
    %c0 = arith.constant 0 : index
    %c0_0 = arith.constant 0 : index
    %0 = vector.load %arg1[%c0, %c0_0] : memref<16x128xf32, #tpu.memory_space<vmem>>, vector<16x128xf32>
    %1 = math.absf %0 : vector<16x128xf32>
    %cst = arith.constant 0.000000e+00 : f32
    %2 = vector.broadcast %cst : f32 to vector<16x128xf32>
    %3 = arith.subf %2, %1 : vector<16x128xf32>
    %4 = math.exp %3 : vector<16x128xf32>
    %5 = arith.mulf %0, %0 : vector<16x128xf32>
    %cst_1 = arith.constant 1.000000e+00 : f32
    %6 = vector.broadcast %cst_1 : f32 to vector<16x128xf32>
    %7 = arith.addf %5, %6 : vector<16x128xf32>
    %8 = arith.subf %7, %4 : vector<16x128xf32>
    %cst_2 = arith.constant 1.000000e+00 : f32
    %9 = vector.broadcast %cst_2 : f32 to vector<16x128xf32>
    %10 = arith.subf %4, %9 : vector<16x128xf32>
    %cst_3 = arith.constant 0.000000e+00 : f32
    %11 = vector.broadcast %cst_3 : f32 to vector<16x128xf32>
    %12 = arith.cmpf ogt, %0, %11 : vector<16x128xf32>
    %13 = arith.select %12, %8, %10 : vector<16x128xi1>, vector<16x128xf32>
    %c0_4 = arith.constant 0 : index
    %c0_5 = arith.constant 0 : index
    %14 = vector.load %arg2[%c0_4, %c0_5] : memref<16x128xf32, #tpu.memory_space<vmem>>, vector<16x128xf32>
    tpu.vector_store %arg2[%c0_4, %c0_5], %13 {strides = array<i32>} : memref<16x128xf32, #tpu.memory_space<vmem>>, vector<16x128xf32>,
    return
  }
  func.func @transform_0(%arg0: i32) -> (i32, i32) {
    %c0_i32 = arith.constant 0 : i32
    %c0_i32_0 = arith.constant 0 : i32
    return %arg0, %c0_i32 : i32, i32
  }
  func.func @transform_1(%arg0: i32) -> (i32, i32) {
    %c0_i32 = arith.constant 0 : i32
    %c0_i32_0 = arith.constant 0 : i32
    return %arg0, %c0_i32 : i32, i32
  }
}

</mosaic_0001>

<bundles_post_ra>
// kernel: tpu_custom_call.1
= control target key start
LH: loop header
LB: loop body
LE: loop exit
PB: predicated region body
PF: predicated region fallthrough
CT: control target
= control target key end

     0   :  { %6 = vsyncpa [#allocation3], 0  ;;  %s166_s0 = inlined_call_operand.hbm [shape: f32[16,128], index: 0, kind: input, shape index: {}]   ;;  %s167_s1 = inlined_call_operand.hbm [shape: f32[16,128], index: 1, kind: output, shape index: {}]  }
   0x1   :  { %7 = vsyncpa [#allocation4], 0  ;;  %s122_s6 = smov [#allocation2]   ;;  %s74_s10 = scalar_lea.hbm %s166_s0, 256 }
   0x2   :  { %s13_s7 = sshll.u32 %s122_s6, 4  ;;  %p75_p0 = scmp.ne.s32.totalorder %s166_s0, %s74_s10  ;;  %s14_s7 = int_to_ptr.vmem [resolvable:$true] %s13_s7 }
   0x3   :  { %p78_p1 = scmp.lt.u32.totalorder %s74_s10, %s166_s0 }
   0x5   :  { %p80_p2 = pnand %p78_p1, %p75_p0 }
   0x7   :  { %83 = shalt.err (!%p80_p2)
}
   0x8   :  { %s84_s15 = scalar_lea.vmem %s14_s7, 256  ;;  %p89_p4 = scmp.lt.s32.totalorder %s14_s7, %s14_s7 }
   0x9   :  { %p85_p3 = scmp.ne.s32.totalorder %s14_s7, %s84_s15  ;;  %p90_p5 = scmp.lt.s32.totalorder %s84_s15, %s84_s15 }
   0xb   :  { %p91_p6 = por %p90_p5, %p89_p4 }
   0xd   :  { %p92_p7 = pnand %p91_p6, %p85_p3 }
   0xf   :  { %95 = shalt.err (!%p92_p7)
}
  0x10   :  { %s123_s16 = smov 128   ;;  %s124_s17 = smov 8  }
  0x11   :  { %19 = dma.hbm_to_vmem [thread:$0]  %s166_s0, 256, %s14_s7, [#allocation3], %s123_s16, %s123_s16, %s124_s17  }
  0x12   :  { %118 = dma.done.wait [#allocation3], 256  }
  0x13   :  { %119 = vsyncadd [#allocation3], 4294967040  ;;  %v23_v0 = vld [vmem:[#allocation2] sm:$0xff]  ;;  %v24_v1 = vld [vmem:[#allocation2 + $0x8] sm:$0xff]  ;;  %s125_s20 = smov [#allocation5]  }
  0x14   :  { %v25_v2 = vand.u32 2147483647, %v23_v0  ;;  %v26_v3 = vand.u32 2147483647, %v24_v1  ;;  %v33_v8 = vmul.f32 %v23_v0, %v23_v0  ;;  %v34_v9 = vmul.f32 %v24_v1, %v24_v1  ;;  %s52_s0 = sshll.u32 %s125_s20, 4  ;;  %s53_s0 = int_to_ptr.vmem [resolvable:$true] %s52_s0 }
  0x15   :  { %vm41_vm0 = vcmp.gt.f32.partialorder %v23_v0, 0.0  ;;  %vm42_vm1 = vcmp.gt.f32.partialorder %v24_v1, 0.0  ;;  %s96_s21 = scalar_lea.vmem %s53_s0, 256  ;;  %p101_p9 = scmp.lt.s32.totalorder %s53_s0, %s53_s0 }
  0x16   :  { %v27_v4 = vsub.f32 0.0, %v25_v2  ;;  %v28_v5 = vsub.f32 0.0, %v26_v3  ;;  %v35_v10 = vadd.f32 1.0, %v33_v8  ;;  %v36_v11 = vadd.f32 1.0, %v34_v9  ;;  %p97_p8 = scmp.ne.s32.totalorder %s53_s0, %s96_s21  ;;  %p102_p10 = scmp.lt.s32.totalorder %s96_s21, %s96_s21 }
  0x18   :  { %v29_v6 = vmul.f32 1.442695, %v27_v4  ;;  %v31_v7 = vmul.f32 1.442695, %v28_v5  ;;  %p103_p11 = por %p102_p10, %p101_p9 }
  0x1a   :  { %70 = vpow2.f32 %v29_v6  ;;  %p104_p12 = pnand %p103_p11, %p97_p8 }
  0x1b   :  { %72 = vpow2.f32 %v31_v7 }
  0x24   :  { %v71_v12 = vpop.eup %70 }
  0x25   :  { %v73_v13 = vpop.eup %72  ;;  %v37_v14 = vsub.f32 %v35_v10, %v71_v12  ;;  %v64_v15 = vadd.f32 -1.0, %v71_v12 }
  0x26   :  { %v38_v16 = vsub.f32 %v36_v11, %v73_v13  ;;  %v65_v17 = vadd.f32 -1.0, %v73_v13 }
  0x27   :  { %v43_v18 = vsel %vm41_vm0, %v37_v14, %v64_v15 }
  0x28   :  { %45 = vst [vmem:[#allocation5] sm:$0xff] %v43_v18  ;;  %v44_v19 = vsel %vm42_vm1, %v38_v16, %v65_v17 }
  0x29   :  { %46 = vst [vmem:[#allocation5 + $0x8] sm:$0xff] %v44_v19 }
  0x2a   :  { %107 = shalt.err (!%p104_p12)
}
  0x2b   :  { %s108_s24 = scalar_lea.hbm %s167_s1, 256 }
  0x2c   :  { %p109_p13 = scmp.ne.s32.totalorder %s167_s1, %s108_s24  ;;  %p112_p0 = scmp.lt.u32.totalorder %s108_s24, %s167_s1 }
  0x2e   :  { %p114_p1 = pnand %p112_p0, %p109_p13 }
  0x30   :  { %117 = shalt.err (!%p114_p1)
}
  0x31   :  { %58 = dma.vmem_to_hbm [thread:$0]  %s53_s0, 256, %s167_s1, [#allocation4], %s123_s16, %s123_s16, %s124_s17  }
  0x32   :  { %120 = dma.done.wait [#allocation4], 256  }
  0x33   :  { %121 = vsyncadd [#allocation4], 4294967040 }
  0x34   :  { %62 = vsyncpa [#allocation3], 1 }
  0x35   :  { %63 = vsyncpa [#allocation4], 1 }

</bundles_post_ra>
